<compile_context>
chip_gen: v6e
topology: v6e:2x2x1
jax: 0.10.0
libtpu: 0.0.40
codegen_flags: <defaults>
</compile_context>

<pallas_src>
import functools
import math

import jax
import jax.numpy as jnp
import numpy as np
from jax.experimental import pallas as pl
from jax.experimental.pallas import tpu as pltpu


def attention_conv_kernel(x_ref, y_ref, wq_ref, wk_ref, wv_ref, rel_ref, mask_ref,
                          o_ref, *, W, ks, padding):
    HW = y_ref.shape[2]
    xf = x_ref[0]                                   # (Cin, L)   row-padded image, flat
    yf = y_ref[0]                                   # (Cin, HW)

    # ---- 1x1 Q/K/V convs: one MXU matmul each (hoisted out of the tap loop) ------
    q = jnp.dot(wq_ref[...], yf, preferred_element_type=jnp.float32)    # (OCb, HW)
    kf = jnp.dot(wk_ref[...], xf, preferred_element_type=jnp.float32)   # (OCb, L)
    vf = jnp.dot(wv_ref[...], xf, preferred_element_type=jnp.float32)   # (OCb, L)

    # ---- online (flash-style) softmax over the ks*ks taps, statically unrolled ----
    # Tap (th, tw) of the padded neighbourhood is the contiguous lane-slice
    # kf[:, th*W+tw : th*W+tw+HW]; lanes whose column walks off the image would
    # read the neighbouring row, so they are masked back to the zero-padding value
    # (mask precomputed in the wrapper; interior column tw == padding needs none).
    m = denom = acc = None
    for n in range(ks * ks):
        th, tw = n // ks, n % ks
        off = th * W + tw                           # static flat offset of this tap
        k_n = kf[:, off:off + HW]
        v_n = vf[:, off:off + HW]
        if tw != padding:                           # border columns of this tap
            col_ok = mask_ref[tw]                   # (1, HW)
            k_n = k_n * col_ok
            v_n = v_n * col_ok
        logit = q * (k_n + rel_ref[n])              # rel: (OCb, 1) lane-broadcast
        if n == 0:
            m, denom, acc = logit, jnp.ones_like(logit), v_n
        else:
            m_new = jnp.maximum(m, logit)
            alpha = jnp.exp(m - m_new)              # EUP
            e = jnp.exp(logit - m_new)              # EUP
            denom = denom * alpha + e
            acc = acc * alpha + e * v_n
            m = m_new

    # EUP approximate reciprocal + one Newton step instead of a VPU divide.
    inv = pl.reciprocal(denom, approx=True)
    inv = inv * (2.0 - denom * inv)
    o_ref[0] = (acc * inv).astype(o_ref.dtype)      # (OCb, HW): unmasked, lane-dense


def attention_conv(x, y, wq, wk, wv, rel_h, rel_w, *,
                   kernel_size=3, stride=1, padding=1, groups=4,
                   compute_dtype=jnp.float32, oc_block=None):
    # TODO(synk): general stride (>1) not implemented; module as used needs same-size output.
    assert stride == 1 and 2 * padding == kernel_size - 1
    B, Cin, H, W = x.shape
    OC = wq.shape[0]
    # `groups` only reshapes channels in the reference module; the per-channel
    # softmax over taps is unchanged, so it does not enter the kernel math.
    assert OC % groups == 0
    ks = kernel_size
    kk = ks * ks
    HW = H * W
    Hp = H + 2 * padding
    L = Hp * W + 2 * padding        # row padding + flat slack so all tap slices fit

    # ---- glue: row-pad + flatten (x streams through HBM exactly once; no im2col) --
    x_rp = jnp.pad(x, ((0, 0), (0, 0), (padding, padding), (0, 0)))
    x_flat = jnp.pad(x_rp.reshape(B, Cin, Hp * W),
                     ((0, 0), (0, 0), (padding, padding))).astype(compute_dtype)
    y_flat = y.reshape(B, Cin, HW).astype(compute_dtype)

    # 1x1 conv weights: (OC, Cin, 1, 1) -> (OC, Cin)
    wq_m = wq.reshape(OC, Cin).astype(compute_dtype)
    wk_m = wk.reshape(OC, Cin).astype(compute_dtype)
    wv_m = wv.reshape(OC, Cin).astype(compute_dtype)

    # rel_h (OC/2,1,1,ks,1): first OC/2 channels, indexed by kh.
    # rel_w (OC/2,1,1,1,ks): last  OC/2 channels, indexed by kw.
    rel_h2 = rel_h.reshape(OC // 2, ks)
    rel_w2 = rel_w.reshape(OC // 2, ks)
    rel_hp = jnp.broadcast_to(rel_h2.T[:, None, :], (ks, ks, OC // 2))
    rel_wp = jnp.broadcast_to(rel_w2.T[None, :, :], (ks, ks, OC // 2))
    rel_full = jnp.concatenate([rel_hp, rel_wp], axis=-1)       # (kh, kw, OC)
    rel_full = rel_full.reshape(kk, OC, 1).astype(jnp.float32)

    # Column-validity masks for each horizontal tap offset (precomputed once).
    col = jnp.arange(HW, dtype=jnp.int32) % W
    col_mask = jnp.stack(
        [jnp.logical_and(col + (tw - padding) >= 0,
                         col + (tw - padding) < W).astype(jnp.float32)
         for tw in range(ks)], axis=0).reshape(ks, 1, HW)

    # ---- grid: batch x output-channel blocks --------------------------------------
    if oc_block is None:
        oc_block = 128 if (OC > 128 and OC % 128 == 0) else OC
    assert OC % oc_block == 0 and (oc_block == OC or oc_block % 8 == 0)
    n_oc = OC // oc_block
    # TODO(synk): for very large H*W on v7x (64 MiB VMEM) add a halo'd row-tiling grid
    # axis (manual DMA of the overlapping (TH+2p)-row window); whole images fit here.

    isz = jnp.dtype(compute_dtype).itemsize
    cost = pl.CostEstimate(
        flops=int(B * (2 * OC * Cin * (2 * L + HW) + 10 * kk * OC * HW)),
        transcendentals=int(B * OC * HW * (2 * kk + 1)),
        bytes_accessed=int(B * Cin * (L + HW) * isz + 3 * OC * Cin * isz
                           + kk * OC * 4 + ks * HW * 4 + B * OC * HW * 4),
    )
    # Double-buffered blocks + in-kernel f32 temporaries; only raise the scoped
    # VMEM limit when the default would actually be exceeded.
    vmem_need = (2 * Cin * (L + HW) * isz + 6 * oc_block * Cin * isz
                 + 2 * kk * oc_block * 4 + 2 * ks * HW * 4
                 + 2 * oc_block * HW * 4 + (2 * L + 10 * HW) * oc_block * 4)
    vmem_limit = None if vmem_need < (12 << 20) else min(int(vmem_need * 3 // 2), 110 << 20)

    kernel = functools.partial(attention_conv_kernel, W=W, ks=ks, padding=padding)
    out_flat = pl.pallas_call(
        kernel,
        out_shape=jax.ShapeDtypeStruct((B, OC, HW), jnp.float32),
        grid_spec=pltpu.PrefetchScalarGridSpec(
            num_scalar_prefetch=0,
            grid=(B, n_oc),
            in_specs=[
                pl.BlockSpec((1, Cin, L), lambda b, c: (b, 0, 0)),
                pl.BlockSpec((1, Cin, HW), lambda b, c: (b, 0, 0)),
                pl.BlockSpec((oc_block, Cin), lambda b, c: (c, 0)),
                pl.BlockSpec((oc_block, Cin), lambda b, c: (c, 0)),
                pl.BlockSpec((oc_block, Cin), lambda b, c: (c, 0)),
                pl.BlockSpec((kk, oc_block, 1), lambda b, c: (0, c, 0)),
                pl.BlockSpec((ks, 1, HW), lambda b, c: (0, 0, 0)),
            ],
            out_specs=pl.BlockSpec((1, oc_block, HW), lambda b, c: (b, c, 0)),
        ),
        compiler_params=pltpu.CompilerParams(
            dimension_semantics=("parallel", "parallel"),
            vmem_limit_bytes=vmem_limit,
        ),
        cost_estimate=cost,
    )(x_flat, y_flat, wq_m, wk_m, wv_m, rel_full, col_mask)

    return out_flat.reshape(B, OC, H, W)            # already NCHW


def reference_attention_conv(x, y, wq, wk, wv, rel_h, rel_w, *, kernel_size=3, padding=1):
    """Pure-JAX mirror of the PyTorch forward (NCHW), used only for verification."""
    B, Cin, H, W = x.shape
    OC = wq.shape[0]
    ks = kernel_size
    xpad = jnp.pad(x, ((0, 0), (0, 0), (padding, padding), (padding, padding)))

    def conv1x1(t, w):
        return jnp.einsum('bchw,oc->bohw', t, w.reshape(OC, Cin),
                          precision=jax.lax.Precision.HIGHEST)

    q_out = conv1x1(y, wq)
    k_out = conv1x1(xpad, wk)
    v_out = conv1x1(xpad, wv)

    def unfold(t):
        rows = []
        for p in range(ks):
            cols = [t[:, :, p:p + H, q:q + W] for q in range(ks)]
            rows.append(jnp.stack(cols, axis=-1))                    # (B,OC,H,W,kw)
        return jnp.stack(rows, axis=-2)                              # (B,OC,H,W,kh,kw)

    k_w = unfold(k_out)
    v_w = unfold(v_out)
    rel_h_b = rel_h.reshape(1, OC // 2, 1, 1, ks, 1)
    rel_w_b = rel_w.reshape(1, OC // 2, 1, 1, 1, ks)
    k_w = jnp.concatenate([k_w[:, :OC // 2] + rel_h_b,
                           k_w[:, OC // 2:] + rel_w_b], axis=1)
    k_w = k_w.reshape(B, OC, H, W, ks * ks)
    v_w = v_w.reshape(B, OC, H, W, ks * ks)
    logits = q_out[..., None] * k_w
    attn = jax.nn.softmax(logits, axis=-1)
    return jnp.sum(attn * v_w, axis=-1)


if __name__ == "__main__":
    B, Cin, H, W = 2, 4, 16, 16
    OC, groups, ks, pad = 8, 4, 3, 1

    key = jax.random.PRNGKey(0)
    kx, ky, kq, kk_, kv, krh, krw = jax.random.split(key, 7)

    x = jax.random.normal(kx, (B, Cin, H, W), jnp.float32)
    y = jax.random.normal(ky, (B, Cin, H, W), jnp.float32)

    # kaiming_normal_(mode='fan_out', relu) for a 1x1 conv: std = sqrt(2 / OC)
    std = math.sqrt(2.0 / OC)
    wq = jax.random.normal(kq, (OC, Cin, 1, 1), jnp.float32) * std
    wk = jax.random.normal(kk_, (OC, Cin, 1, 1), jnp.float32) * std
    wv = jax.random.normal(kv, (OC, Cin, 1, 1), jnp.float32) * std
    rel_h = jax.random.normal(krh, (OC // 2, 1, 1, ks, 1), jnp.float32)
    rel_w = jax.random.normal(krw, (OC // 2, 1, 1, 1, ks), jnp.float32)

    # On v6e/v7x pass compute_dtype=jnp.bfloat16 to halve HBM bytes and double MXU
    # throughput (accumulation stays f32 in-kernel); f32 here for the tight check.
    out = attention_conv(x, y, wq, wk, wv, rel_h, rel_w,
                         kernel_size=ks, stride=1, padding=pad, groups=groups)
    out = jax.block_until_ready(out)
    assert out.shape == (B, OC, H, W)

    ref = reference_attention_conv(x, y, wq, wk, wv, rel_h, rel_w,
                                   kernel_size=ks, padding=pad)
    np.testing.assert_allclose(np.asarray(out), np.asarray(ref), rtol=2e-3, atol=2e-3)

    print("KERNEL_OK")
</pallas_src>

<mosaic_0001>
module attributes {stable_mosaic.version = 11 : i64} {
  func.func @attention_conv_kernel(%arg0: i32, %arg1: i32, %arg2: memref<1x4x290xf32, #tpu.memory_space<vmem>>, %arg3: memref<1x4x256xf32, #tpu.memory_space<vmem>>, %arg4: memref<8x4xf32, #tpu.memory_space<vmem>>, %arg5: memref<8x4xf32, #tpu.memory_space<vmem>>, %arg6: memref<8x4xf32, #tpu.memory_space<vmem>>, %arg7: memref<9x8x1xf32, #tpu.memory_space<vmem>>, %arg8: memref<3x1x256xf32, #tpu.memory_space<vmem>>, %arg9: memref<1x8x256xf32, #tpu.memory_space<vmem>>) attributes {dimension_semantics = [#tpu.dimension_semantics<parallel>, #tpu.dimension_semantics<parallel>], iteration_bounds = array<i64: 2, 1>, scalar_prefetch = 0 : i64, scratch_operands = 0 : i64, tpu.core_type = #tpu.core_type<tc>, window_params = [{transform_indices = @transform_0, window_bounds = array<i64: 1, 4, 290>}, {transform_indices = @transform_1, window_bounds = array<i64: 1, 4, 256>}, {transform_indices = @transform_2, window_bounds = array<i64: 8, 4>}, {transform_indices = @transform_3, window_bounds = array<i64: 8, 4>}, {transform_indices = @transform_4, window_bounds = array<i64: 8, 4>}, {transform_indices = @transform_5, window_bounds = array<i64: 9, 8, 1>}, {pipeline_mode = #tpu.pipeline_mode<synchronous>, transform_indices = @transform_6, window_bounds = array<i64: 3, 1, 256>}, {transform_indices = @transform_7, window_bounds = array<i64: 1, 8, 256>}]} {
    %c0 = arith.constant 0 : index
    %c0_0 = arith.constant 0 : index
    %c0_1 = arith.constant 0 : index
    %0 = vector.load %arg2[%c0, %c0_0, %c0_1] : memref<1x4x290xf32, #tpu.memory_space<vmem>>, vector<1x4x290xf32>
    %1 = vector.shape_cast %0 : vector<1x4x290xf32> to vector<4x290xf32>
    %c0_2 = arith.constant 0 : index
    %c0_3 = arith.constant 0 : index
    %c0_4 = arith.constant 0 : index
    %2 = vector.load %arg3[%c0_2, %c0_3, %c0_4] : memref<1x4x256xf32, #tpu.memory_space<vmem>>, vector<1x4x256xf32>
    %3 = vector.shape_cast %2 : vector<1x4x256xf32> to vector<4x256xf32>
    %c0_5 = arith.constant 0 : index
    %c0_6 = arith.constant 0 : index
    %4 = vector.load %arg4[%c0_5, %c0_6] : memref<8x4xf32, #tpu.memory_space<vmem>>, vector<8x4xf32>
    %cst = arith.constant dense<0.000000e+00> : vector<8x256xf32>
    %5 = tpu.matmul %4, %3, %cst {dimension_numbers = #tpu.dot_dimension_numbers<[1], [0], [0], [1], [0, 0, 1, 1], [], []>} : vector<8x4xf32>, vector<4x256xf32>, vector<8x256xf32> -> vector<8x256xf32>
    %c0_7 = arith.constant 0 : index
    %c0_8 = arith.constant 0 : index
    %6 = vector.load %arg5[%c0_7, %c0_8] : memref<8x4xf32, #tpu.memory_space<vmem>>, vector<8x4xf32>
    %cst_9 = arith.constant dense<0.000000e+00> : vector<8x290xf32>
    %7 = tpu.matmul %6, %1, %cst_9 {dimension_numbers = #tpu.dot_dimension_numbers<[1], [0], [0], [1], [0, 0, 1, 1], [], []>} : vector<8x4xf32>, vector<4x290xf32>, vector<8x290xf32> -> vector<8x290xf32>
    %c0_10 = arith.constant 0 : index
    %c0_11 = arith.constant 0 : index
    %8 = vector.load %arg6[%c0_10, %c0_11] : memref<8x4xf32, #tpu.memory_space<vmem>>, vector<8x4xf32>
    %cst_12 = arith.constant dense<0.000000e+00> : vector<8x290xf32>
    %9 = tpu.matmul %8, %1, %cst_12 {dimension_numbers = #tpu.dot_dimension_numbers<[1], [0], [0], [1], [0, 0, 1, 1], [], []>} : vector<8x4xf32>, vector<4x290xf32>, vector<8x290xf32> -> vector<8x290xf32>
    %10 = vector.extract_strided_slice %7 {offsets = [0, 0], sizes = [8, 256], strides = [1, 1]} : vector<8x290xf32> to vector<8x256xf32>
    %11 = vector.extract_strided_slice %9 {offsets = [0, 0], sizes = [8, 256], strides = [1, 1]} : vector<8x290xf32> to vector<8x256xf32>
    %c0_13 = arith.constant 0 : index
    %c0_14 = arith.constant 0 : index
    %c0_15 = arith.constant 0 : index
    %12 = vector.load %arg8[%c0_13, %c0_14, %c0_15] : memref<3x1x256xf32, #tpu.memory_space<vmem>>, vector<1x1x256xf32>
    %13 = vector.shape_cast %12 : vector<1x1x256xf32> to vector<1x256xf32>
    %14 = vector.broadcast %13 : vector<1x256xf32> to vector<8x256xf32>
    %15 = arith.mulf %10, %14 : vector<8x256xf32>
    %16 = vector.broadcast %13 : vector<1x256xf32> to vector<8x256xf32>
    %17 = arith.mulf %11, %16 : vector<8x256xf32>
    %c0_16 = arith.constant 0 : index
    %c0_17 = arith.constant 0 : index
    %c0_18 = arith.constant 0 : index
    %18 = vector.load %arg7[%c0_16, %c0_17, %c0_18] : memref<9x8x1xf32, #tpu.memory_space<vmem>>, vector<1x8x1xf32>
    %19 = vector.shape_cast %18 : vector<1x8x1xf32> to vector<8x1xf32>
    %20 = vector.broadcast %19 : vector<8x1xf32> to vector<8x256xf32>
    %21 = arith.addf %15, %20 : vector<8x256xf32>
    %22 = arith.mulf %5, %21 : vector<8x256xf32>
    %cst_19 = arith.constant 1.000000e+00 : f32
    %23 = vector.broadcast %cst_19 : f32 to vector<8x256xf32>
    %24 = vector.extract_strided_slice %7 {offsets = [0, 1], sizes = [8, 256], strides = [1, 1]} : vector<8x290xf32> to vector<8x256xf32>
    %25 = vector.extract_strided_slice %9 {offsets = [0, 1], sizes = [8, 256], strides = [1, 1]} : vector<8x290xf32> to vector<8x256xf32>
    %c1 = arith.constant 1 : index
    %c0_20 = arith.constant 0 : index
    %c0_21 = arith.constant 0 : index
    %26 = vector.load %arg7[%c1, %c0_20, %c0_21] : memref<9x8x1xf32, #tpu.memory_space<vmem>>, vector<1x8x1xf32>
    %27 = vector.shape_cast %26 : vector<1x8x1xf32> to vector<8x1xf32>
    %28 = vector.broadcast %27 : vector<8x1xf32> to vector<8x256xf32>
    %29 = arith.addf %24, %28 : vector<8x256xf32>
    %30 = arith.mulf %5, %29 : vector<8x256xf32>
    %31 = arith.maximumf %22, %30 : vector<8x256xf32>
    %32 = arith.subf %22, %31 : vector<8x256xf32>
    %33 = math.exp %32 : vector<8x256xf32>
    %34 = arith.subf %30, %31 : vector<8x256xf32>
    %35 = math.exp %34 : vector<8x256xf32>
    %36 = arith.mulf %23, %33 : vector<8x256xf32>
    %37 = arith.addf %36, %35 : vector<8x256xf32>
    %38 = arith.mulf %17, %33 : vector<8x256xf32>
    %39 = arith.mulf %35, %25 : vector<8x256xf32>
    %40 = arith.addf %38, %39 : vector<8x256xf32>
    %41 = vector.extract_strided_slice %7 {offsets = [0, 2], sizes = [8, 256], strides = [1, 1]} : vector<8x290xf32> to vector<8x256xf32>
    %42 = vector.extract_strided_slice %9 {offsets = [0, 2], sizes = [8, 256], strides = [1, 1]} : vector<8x290xf32> to vector<8x256xf32>
    %c2 = arith.constant 2 : index
    %c0_22 = arith.constant 0 : index
    %c0_23 = arith.constant 0 : index
    %43 = vector.load %arg8[%c2, %c0_22, %c0_23] : memref<3x1x256xf32, #tpu.memory_space<vmem>>, vector<1x1x256xf32>
    %44 = vector.shape_cast %43 : vector<1x1x256xf32> to vector<1x256xf32>
    %45 = vector.broadcast %44 : vector<1x256xf32> to vector<8x256xf32>
    %46 = arith.mulf %41, %45 : vector<8x256xf32>
    %47 = vector.broadcast %44 : vector<1x256xf32> to vector<8x256xf32>
    %48 = arith.mulf %42, %47 : vector<8x256xf32>
    %c2_24 = arith.constant 2 : index
    %c0_25 = arith.constant 0 : index
    %c0_26 = arith.constant 0 : index
    %49 = vector.load %arg7[%c2_24, %c0_25, %c0_26] : memref<9x8x1xf32, #tpu.memory_space<vmem>>, vector<1x8x1xf32>
    %50 = vector.shape_cast %49 : vector<1x8x1xf32> to vector<8x1xf32>
    %51 = vector.broadcast %50 : vector<8x1xf32> to vector<8x256xf32>
    %52 = arith.addf %46, %51 : vector<8x256xf32>
    %53 = arith.mulf %5, %52 : vector<8x256xf32>
    %54 = arith.maximumf %31, %53 : vector<8x256xf32>
    %55 = arith.subf %31, %54 : vector<8x256xf32>
    %56 = math.exp %55 : vector<8x256xf32>
    %57 = arith.subf %53, %54 : vector<8x256xf32>
    %58 = math.exp %57 : vector<8x256xf32>
    %59 = arith.mulf %37, %56 : vector<8x256xf32>
    %60 = arith.addf %59, %58 : vector<8x256xf32>
    %61 = arith.mulf %40, %56 : vector<8x256xf32>
    %62 = arith.mulf %58, %48 : vector<8x256xf32>
    %63 = arith.addf %61, %62 : vector<8x256xf32>
    %64 = vector.extract_strided_slice %7 {offsets = [0, 16], sizes = [8, 256], strides = [1, 1]} : vector<8x290xf32> to vector<8x256xf32>
    %65 = vector.extract_strided_slice %9 {offsets = [0, 16], sizes = [8, 256], strides = [1, 1]} : vector<8x290xf32> to vector<8x256xf32>
    %c0_27 = arith.constant 0 : index
    %c0_28 = arith.constant 0 : index
    %c0_29 = arith.constant 0 : index
    %66 = vector.load %arg8[%c0_27, %c0_28, %c0_29] : memref<3x1x256xf32, #tpu.memory_space<vmem>>, vector<1x1x256xf32>
    %67 = vector.shape_cast %66 : vector<1x1x256xf32> to vector<1x256xf32>
    %68 = vector.broadcast %67 : vector<1x256xf32> to vector<8x256xf32>
    %69 = arith.mulf %64, %68 : vector<8x256xf32>
    %70 = vector.broadcast %67 : vector<1x256xf32> to vector<8x256xf32>
    %71 = arith.mulf %65, %70 : vector<8x256xf32>
    %c3 = arith.constant 3 : index
    %c0_30 = arith.constant 0 : index
    %c0_31 = arith.constant 0 : index
    %72 = vector.load %arg7[%c3, %c0_30, %c0_31] : memref<9x8x1xf32, #tpu.memory_space<vmem>>, vector<1x8x1xf32>
    %73 = vector.shape_cast %72 : vector<1x8x1xf32> to vector<8x1xf32>
    %74 = vector.broadcast %73 : vector<8x1xf32> to vector<8x256xf32>
    %75 = arith.addf %69, %74 : vector<8x256xf32>
    %76 = arith.mulf %5, %75 : vector<8x256xf32>
    %77 = arith.maximumf %54, %76 : vector<8x256xf32>
    %78 = arith.subf %54, %77 : vector<8x256xf32>
    %79 = math.exp %78 : vector<8x256xf32>
    %80 = arith.subf %76, %77 : vector<8x256xf32>
    %81 = math.exp %80 : vector<8x256xf32>
    %82 = arith.mulf %60, %79 : vector<8x256xf32>
    %83 = arith.addf %82, %81 : vector<8x256xf32>
    %84 = arith.mulf %63, %79 : vector<8x256xf32>
    %85 = arith.mulf %81, %71 : vector<8x256xf32>
    %86 = arith.addf %84, %85 : vector<8x256xf32>
    %87 = vector.extract_strided_slice %7 {offsets = [0, 17], sizes = [8, 256], strides = [1, 1]} : vector<8x290xf32> to vector<8x256xf32>
    %88 = vector.extract_strided_slice %9 {offsets = [0, 17], sizes = [8, 256], strides = [1, 1]} : vector<8x290xf32> to vector<8x256xf32>
    %c4 = arith.constant 4 : index
    %c0_32 = arith.constant 0 : index
    %c0_33 = arith.constant 0 : index
    %89 = vector.load %arg7[%c4, %c0_32, %c0_33] : memref<9x8x1xf32, #tpu.memory_space<vmem>>, vector<1x8x1xf32>
    %90 = vector.shape_cast %89 : vector<1x8x1xf32> to vector<8x1xf32>
    %91 = vector.broadcast %90 : vector<8x1xf32> to vector<8x256xf32>
    %92 = arith.addf %87, %91 : vector<8x256xf32>
    %93 = arith.mulf %5, %92 : vector<8x256xf32>
    %94 = arith.maximumf %77, %93 : vector<8x256xf32>
    %95 = arith.subf %77, %94 : vector<8x256xf32>
    %96 = math.exp %95 : vector<8x256xf32>
    %97 = arith.subf %93, %94 : vector<8x256xf32>
    %98 = math.exp %97 : vector<8x256xf32>
    %99 = arith.mulf %83, %96 : vector<8x256xf32>
    %100 = arith.addf %99, %98 : vector<8x256xf32>
    %101 = arith.mulf %86, %96 : vector<8x256xf32>
    %102 = arith.mulf %98, %88 : vector<8x256xf32>
    %103 = arith.addf %101, %102 : vector<8x256xf32>
    %104 = vector.extract_strided_slice %7 {offsets = [0, 18], sizes = [8, 256], strides = [1, 1]} : vector<8x290xf32> to vector<8x256xf32>
    %105 = vector.extract_strided_slice %9 {offsets = [0, 18], sizes = [8, 256], strides = [1, 1]} : vector<8x290xf32> to vector<8x256xf32>
    %c2_34 = arith.constant 2 : index
    %c0_35 = arith.constant 0 : index
    %c0_36 = arith.constant 0 : index
    %106 = vector.load %arg8[%c2_34, %c0_35, %c0_36] : memref<3x1x256xf32, #tpu.memory_space<vmem>>, vector<1x1x256xf32>
    %107 = vector.shape_cast %106 : vector<1x1x256xf32> to vector<1x256xf32>
    %108 = vector.broadcast %107 : vector<1x256xf32> to vector<8x256xf32>
    %109 = arith.mulf %104, %108 : vector<8x256xf32>
    %110 = vector.broadcast %107 : vector<1x256xf32> to vector<8x256xf32>
    %111 = arith.mulf %105, %110 : vector<8x256xf32>
    %c5 = arith.constant 5 : index
    %c0_37 = arith.constant 0 : index
    %c0_38 = arith.constant 0 : index
    %112 = vector.load %arg7[%c5, %c0_37, %c0_38] : memref<9x8x1xf32, #tpu.memory_space<vmem>>, vector<1x8x1xf32>
    %113 = vector.shape_cast %112 : vector<1x8x1xf32> to vector<8x1xf32>
    %114 = vector.broadcast %113 : vector<8x1xf32> to vector<8x256xf32>
    %115 = arith.addf %109, %114 : vector<8x256xf32>
    %116 = arith.mulf %5, %115 : vector<8x256xf32>
    %117 = arith.maximumf %94, %116 : vector<8x256xf32>
    %118 = arith.subf %94, %117 : vector<8x256xf32>
    %119 = math.exp %118 : vector<8x256xf32>
    %120 = arith.subf %116, %117 : vector<8x256xf32>
    %121 = math.exp %120 : vector<8x256xf32>
    %122 = arith.mulf %100, %119 : vector<8x256xf32>
    %123 = arith.addf %122, %121 : vector<8x256xf32>
    %124 = arith.mulf %103, %119 : vector<8x256xf32>
    %125 = arith.mulf %121, %111 : vector<8x256xf32>
    %126 = arith.addf %124, %125 : vector<8x256xf32>
    %127 = vector.extract_strided_slice %7 {offsets = [0, 32], sizes = [8, 256], strides = [1, 1]} : vector<8x290xf32> to vector<8x256xf32>
    %128 = vector.extract_strided_slice %9 {offsets = [0, 32], sizes = [8, 256], strides = [1, 1]} : vector<8x290xf32> to vector<8x256xf32>
    %c0_39 = arith.constant 0 : index
    %c0_40 = arith.constant 0 : index
    %c0_41 = arith.constant 0 : index
    %129 = vector.load %arg8[%c0_39, %c0_40, %c0_41] : memref<3x1x256xf32, #tpu.memory_space<vmem>>, vector<1x1x256xf32>
    %130 = vector.shape_cast %129 : vector<1x1x256xf32> to vector<1x256xf32>
    %131 = vector.broadcast %130 : vector<1x256xf32> to vector<8x256xf32>
    %132 = arith.mulf %127, %131 : vector<8x256xf32>
    %133 = vector.broadcast %130 : vector<1x256xf32> to vector<8x256xf32>
    %134 = arith.mulf %128, %133 : vector<8x256xf32>
    %c6 = arith.constant 6 : index
    %c0_42 = arith.constant 0 : index
    %c0_43 = arith.constant 0 : index
    %135 = vector.load %arg7[%c6, %c0_42, %c0_43] : memref<9x8x1xf32, #tpu.memory_space<vmem>>, vector<1x8x1xf32>
    %136 = vector.shape_cast %135 : vector<1x8x1xf32> to vector<8x1xf32>
    %137 = vector.broadcast %136 : vector<8x1xf32> to vector<8x256xf32>
    %138 = arith.addf %132, %137 : vector<8x256xf32>
    %139 = arith.mulf %5, %138 : vector<8x256xf32>
    %140 = arith.maximumf %117, %139 : vector<8x256xf32>
    %141 = arith.subf %117, %140 : vector<8x256xf32>
    %142 = math.exp %141 : vector<8x256xf32>
    %143 = arith.subf %139, %140 : vector<8x256xf32>
    %144 = math.exp %143 : vector<8x256xf32>
    %145 = arith.mulf %123, %142 : vector<8x256xf32>
    %146 = arith.addf %145, %144 : vector<8x256xf32>
    %147 = arith.mulf %126, %142 : vector<8x256xf32>
    %148 = arith.mulf %144, %134 : vector<8x256xf32>
    %149 = arith.addf %147, %148 : vector<8x256xf32>
    %150 = vector.extract_strided_slice %7 {offsets = [0, 33], sizes = [8, 256], strides = [1, 1]} : vector<8x290xf32> to vector<8x256xf32>
    %151 = vector.extract_strided_slice %9 {offsets = [0, 33], sizes = [8, 256], strides = [1, 1]} : vector<8x290xf32> to vector<8x256xf32>
    %c7 = arith.constant 7 : index
    %c0_44 = arith.constant 0 : index
    %c0_45 = arith.constant 0 : index
    %152 = vector.load %arg7[%c7, %c0_44, %c0_45] : memref<9x8x1xf32, #tpu.memory_space<vmem>>, vector<1x8x1xf32>
    %153 = vector.shape_cast %152 : vector<1x8x1xf32> to vector<8x1xf32>
    %154 = vector.broadcast %153 : vector<8x1xf32> to vector<8x256xf32>
    %155 = arith.addf %150, %154 : vector<8x256xf32>
    %156 = arith.mulf %5, %155 : vector<8x256xf32>
    %157 = arith.maximumf %140, %156 : vector<8x256xf32>
    %158 = arith.subf %140, %157 : vector<8x256xf32>
    %159 = math.exp %158 : vector<8x256xf32>
    %160 = arith.subf %156, %157 : vector<8x256xf32>
    %161 = math.exp %160 : vector<8x256xf32>
    %162 = arith.mulf %146, %159 : vector<8x256xf32>
    %163 = arith.addf %162, %161 : vector<8x256xf32>
    %164 = arith.mulf %149, %159 : vector<8x256xf32>
    %165 = arith.mulf %161, %151 : vector<8x256xf32>
    %166 = arith.addf %164, %165 : vector<8x256xf32>
    %167 = vector.extract_strided_slice %7 {offsets = [0, 34], sizes = [8, 256], strides = [1, 1]} : vector<8x290xf32> to vector<8x256xf32>
    %168 = vector.extract_strided_slice %9 {offsets = [0, 34], sizes = [8, 256], strides = [1, 1]} : vector<8x290xf32> to vector<8x256xf32>
    %c2_46 = arith.constant 2 : index
    %c0_47 = arith.constant 0 : index
    %c0_48 = arith.constant 0 : index
    %169 = vector.load %arg8[%c2_46, %c0_47, %c0_48] : memref<3x1x256xf32, #tpu.memory_space<vmem>>, vector<1x1x256xf32>
    %170 = vector.shape_cast %169 : vector<1x1x256xf32> to vector<1x256xf32>
    %171 = vector.broadcast %170 : vector<1x256xf32> to vector<8x256xf32>
    %172 = arith.mulf %167, %171 : vector<8x256xf32>
    %173 = vector.broadcast %170 : vector<1x256xf32> to vector<8x256xf32>
    %174 = arith.mulf %168, %173 : vector<8x256xf32>
    %c8 = arith.constant 8 : index
    %c0_49 = arith.constant 0 : index
    %c0_50 = arith.constant 0 : index
    %175 = vector.load %arg7[%c8, %c0_49, %c0_50] : memref<9x8x1xf32, #tpu.memory_space<vmem>>, vector<1x8x1xf32>
    %176 = vector.shape_cast %175 : vector<1x8x1xf32> to vector<8x1xf32>
    %177 = vector.broadcast %176 : vector<8x1xf32> to vector<8x256xf32>
    %178 = arith.addf %172, %177 : vector<8x256xf32>
    %179 = arith.mulf %5, %178 : vector<8x256xf32>
    %180 = arith.maximumf %157, %179 : vector<8x256xf32>
    %181 = arith.subf %157, %180 : vector<8x256xf32>
    %182 = math.exp %181 : vector<8x256xf32>
    %183 = arith.subf %179, %180 : vector<8x256xf32>
    %184 = math.exp %183 : vector<8x256xf32>
    %185 = arith.mulf %163, %182 : vector<8x256xf32>
    %186 = arith.addf %185, %184 : vector<8x256xf32>
    %187 = arith.mulf %166, %182 : vector<8x256xf32>
    %188 = arith.mulf %184, %174 : vector<8x256xf32>
    %189 = arith.addf %187, %188 : vector<8x256xf32>
    %190 = tpu.reciprocal %186 {approx = true} : vector<8x256xf32> -> vector<8x256xf32>
    %191 = arith.mulf %186, %190 : vector<8x256xf32>
    %cst_51 = arith.constant 2.000000e+00 : f32
    %192 = vector.broadcast %cst_51 : f32 to vector<8x256xf32>
    %193 = arith.subf %192, %191 : vector<8x256xf32>
    %194 = arith.mulf %190, %193 : vector<8x256xf32>
    %195 = arith.mulf %189, %194 : vector<8x256xf32>
    %c0_52 = arith.constant 0 : index
    %c0_53 = arith.constant 0 : index
    %c0_54 = arith.constant 0 : index
    %196 = vector.load %arg9[%c0_52, %c0_53, %c0_54] : memref<1x8x256xf32, #tpu.memory_space<vmem>>, vector<1x8x256xf32>
    %197 = vector.shape_cast %196 : vector<1x8x256xf32> to vector<8x256xf32>
    %198 = vector.shape_cast %195 : vector<8x256xf32> to vector<1x8x256xf32>
    tpu.vector_store %arg9[%c0_52, %c0_53, %c0_54], %198 {strides = array<i32>} : memref<1x8x256xf32, #tpu.memory_space<vmem>>, vector<1x8x256xf32>,
    return
  }
  func.func @transform_0(%arg0: i32, %arg1: i32) -> (i32, i32, i32) {
    %c0_i32 = arith.constant 0 : i32
    %c0_i32_0 = arith.constant 0 : i32
    %c0_i32_1 = arith.constant 0 : i32
    return %arg0, %c0_i32, %c0_i32_0 : i32, i32, i32
  }
  func.func @transform_1(%arg0: i32, %arg1: i32) -> (i32, i32, i32) {
    %c0_i32 = arith.constant 0 : i32
    %c0_i32_0 = arith.constant 0 : i32
    %c0_i32_1 = arith.constant 0 : i32
    return %arg0, %c0_i32, %c0_i32_0 : i32, i32, i32
  }
  func.func @transform_2(%arg0: i32, %arg1: i32) -> (i32, i32) {
    %c0_i32 = arith.constant 0 : i32
    %c0_i32_0 = arith.constant 0 : i32
    return %arg1, %c0_i32 : i32, i32
  }
  func.func @transform_3(%arg0: i32, %arg1: i32) -> (i32, i32) {
    %c0_i32 = arith.constant 0 : i32
    %c0_i32_0 = arith.constant 0 : i32
    return %arg1, %c0_i32 : i32, i32
  }
  func.func @transform_4(%arg0: i32, %arg1: i32) -> (i32, i32) {
    %c0_i32 = arith.constant 0 : i32
    %c0_i32_0 = arith.constant 0 : i32
    return %arg1, %c0_i32 : i32, i32
  }
  func.func @transform_5(%arg0: i32, %arg1: i32) -> (i32, i32, i32) {
    %c0_i32 = arith.constant 0 : i32
    %c0_i32_0 = arith.constant 0 : i32
    %c0_i32_1 = arith.constant 0 : i32
    return %c0_i32, %arg1, %c0_i32_0 : i32, i32, i32
  }
  func.func @transform_6(%arg0: i32, %arg1: i32) -> (i32, i32, i32) {
    %c0_i32 = arith.constant 0 : i32
    %c0_i32_0 = arith.constant 0 : i32
    %c0_i32_1 = arith.constant 0 : i32
    %c0_i32_2 = arith.constant 0 : i32
    return %c0_i32, %c0_i32_0, %c0_i32_1 : i32, i32, i32
  }
  func.func @transform_7(%arg0: i32, %arg1: i32) -> (i32, i32, i32) {
    %c0_i32 = arith.constant 0 : i32
    %c0_i32_0 = arith.constant 0 : i32
    return %arg0, %arg1, %c0_i32 : i32, i32, i32
  }
}

</mosaic_0001>

<bundles_post_ra>
// kernel: tpu_custom_call.1
= control target key start
LH: loop header
LB: loop body
LE: loop exit
PB: predicated region body
PF: predicated region fallthrough
CT: control target
= control target key end

     0   :  { %12 = vsyncpa [#allocation3], 0  ;;  %s2465_s0 = inlined_call_operand.vmem [shape: f32[2,4,290], index: 0, kind: input, shape index: {}]   ;;  %s2466_s1 = inlined_call_operand.vmem [shape: f32[2,4,256], index: 1, kind: input, shape index: {}]   ;;  %s2467_s2 = inlined_call_operand.vmem [shape: f32[8,4], index: 2, kind: input, shape index: {}]   ;;  %s2468_s3 = inlined_call_operand.vmem [shape: f32[8,4], index: 3, kind: input, shape index: {}]   ;;  %s2469_s4 = inlined_call_operand.vmem [shape: f32[8,4], index: 4, kind: input, shape index: {}]   ;;  %s2470_s5 = inlined_call_operand.vmem [shape: f32[9,8,1], index: 5, kind: input, shape index: {}]   ;;  %s2471_s6 = inlined_call_operand.vmem [shape: f32[3,1,256], index: 6, kind: input, shape index: {}]   ;;  %s2472_s7 = inlined_call_operand.hbm [shape: f32[2,8,256], index: 7, kind: output, shape index: {}]  }
   0x1   :  { %14 = vsyncpa [#allocation3 + $0x1], 0  ;;  %s1878_s24 = smov 0   ;;  %s1880_s25 = smov 0  }
   0x2   :  { %s1882_s26 = smov 0   ;;  %s1884_s27 = smov 0  }
   0x3   :  { %s1886_s28 = smov 0   ;;  %s1888_s29 = smov 0  }
   0x4 LB: > { %s1543_s30 = sadd.s32 4294967295, %s1819_s29   ;;  %s1544_s8 = sadd.s32 4294967294, %s1819_s29   ;;  %s1819_s29 = sphi %s1888_s29, %s20_s29   ;;  %s1815_s28 = sphi %s1886_s28, %s2479_s28   ;;  %s1811_s27 = sphi %s1884_s27, %s2478_s27   ;;  %s1807_s26 = sphi %s1882_s26, %s2477_s26   ;;  %s1803_s25 = sphi %s1880_s25, %s2476_s25   ;;  %s1799_s24 = sphi %s1878_s24, %s2475_s24  }
   0x5   : > { %s32_s9 = sadd.s32 1, %s1815_s28  ;;  %s218_s10 = sadd.s32 1, %s1807_s26 }
   0x6   : > { %p34_p0 = scmp.ge.s32.totalorder %s32_s9, 2  ;;  %p228_p1 = scmp.ne.s32.totalorder %s1807_s26, %s1803_s25 }
   0x7   : > { %p229_p2 = scmp.eq.s32.totalorder %s1543_s30, 1  ;;  %p234_p3 = scmp.ne.s32.totalorder %s1803_s25, %s1799_s24 }
   0x8   : > { %s2481_s9 = smov (%p34_p0, %s32_s9), 0  ;;  %p235_p5 = scmp.eq.s32.totalorder %s1544_s8, 1 }
   0x9   : > { %p1918_p4 = por %p229_p2, %p228_p1  ;;  %s213_s12 = ssub.s32 %s1815_s28, %s2481_s9 }
   0xa   : > { %p1551_p6 = scmp.ge.s32.totalorder %s1819_s29, 1  ;;  %p216_p7 = scmp.eq.s32.totalorder %s213_s12, 0 }
   0xb   : > { %p1925_p8 = por %p235_p5, %p234_p3  ;;  %p300_p9 = scmp.lt.s32.totalorder %s1819_s29, 3 }
   0xc   : > { %s1931_s14 = scalar_select %p216_p7, %s1807_s26, %s218_s10  }
   0xd   : > { %p301_p10 = pnand %p1551_p6, %p300_p9 }
   0xe   : > { %p353_p11 = scmp.lt.s32.totalorder (!%p301_p10), %s1811_s27, 1  ;;  %s1823_s19 = smov (!%p301_p10), 2  }
   0xf   : > { %304 = sbr.rel (%p301_p10) target bundleno = 468 (0x1d4), region = 48  ;;  %s1825_s15 = smov (!%p301_p10), 16  }
  0x10   : > { %s1827_s23 = smov (!%p301_p10), 32   ;;  %s1829_s18 = smov (!%p301_p10), 111  }
  0x11   : > { %s1832_s22 = smov (!%p301_p10), 126   ;;  %s1835_s30 = smov (!%p301_p10), 95  }
  0x12   : > { %s1836_s8 = smov (!%p301_p10), 94  }
  0x14   : > { %v766_v0 = vlaneseq  ;;  %v1821_v1 = vmov 0.0   ;;  %v1569_v2 = vld [vmem:[%s2470_s5 + $0x8] sm:$0xff]  ;;  %s354_s17 = scalar_select %p353_p11, %s1811_s27, 1  ;;  %v1822_v3 = vmov 0   ;;  %v1570_v5 = vld [vmem:[%s2471_s6 + $0x4] sm:$0x3] }
  0x15   : > { %458 = vmatprep.mubr.f32.mxu0 %v1821_v1  ;;  %542 = vmatprep.mubr.f32.mxu1 %v1821_v1  ;;  %v1571_v6 = vld [vmem:[%s2470_s5 + $0x10] sm:$0xff]  ;;  %vm389_vm0 = vcmask 1043456   ;;  %v382_v13 = vld [vmem:[%s2467_s2] sm:$0xff]  ;;  %vm385_vm1 = vcmask 31744   ;;  %vm1824_vm2 = vmmov 0   ;;  %v1572_v19 = vld [vmem:[%s2470_s5 + $0x18] sm:$0xff] }
  0x16   : > { %1671 = vset.pattern.permute.xlu0 %v1822_v3  ;;  %v767_v4 = vshrl.u32 %v766_v0, 7  ;;  %1672 = vset.pattern.permute.xlu1 %v1822_v3  ;;  %s1583_s20 = sshll.u32 %s354_s17, 3  ;;  %s1599_s21 = smul.u32 12, %s354_s17  ;;  %v465_v14 = vld [vmem:[%s2468_s3] sm:$0xff]  ;;  %v1574_v23 = vld [vmem:[%s2470_s5 + $0x28] sm:$0xff]  ;;  %v1575_v25 = vld [vmem:[%s2470_s5 + $0x30] sm:$0xff] }
  0x17   : > { %794 = vperm.xlu0 %1671, %v1569_v2   ;;  %s362_s10 = scalar_lea.vmem %s2466_s1, %s1583_s20  ;;  %v619_v17 = vld [vmem:[%s2469_s4] sm:$0xff]  ;;  %v1576_v26 = vld [vmem:[%s2470_s5 + $0x38] sm:$0xff]  ;;  %s1830_s20 = smov 127   ;;  %vm944_vm3 = vcmask 130048   ;;  %vm1082_vm4 = vcmask 146432   ;;  %vm866_vm5 = vcmask 15360  }
  0x18   : > { %v768_v7 = vsub.s32 0, %v767_v4  ;;  %v381_v8 = vld [vmem:[%s362_s10] sm:$0xff]  ;;  %s357_s16 = scalar_lea.vmem %s2465_s0, %s1599_s21  ;;  %v772_v16 = vsub.s32 1, %v767_v4  ;;  %vm1160_vm6 = vcmask 261120   ;;  %s1833_s21 = smov 110   ;;  %vm1298_vm7 = vcmask 277504  }
  0x19   : > { %v384_v10 = vcombine.high %v381_v8, %v381_v8  ;;  %v379_v11 = vld [vmem:[%s357_s16] sm:$0xff]  ;;  %v380_v15 = vld [vmem:[%s357_s16 + $0x8] sm:$0xf]  ;;  %vm809_vm8 = vcmask 1039360   ;;  %vm896_vm9 = vcmask 1031168   ;;  %vm974_vm10 = vcmask 916480  }
  0x1a   : > { %v857_v9 = vrot.slane %v1570_v5, %v768_v7  ;;  %v468_v12 = vcombine.high %v379_v11, %v379_v11  ;;  %v861_v18 = vrot.slane %v1570_v5, %v772_v16  ;;  %v764_v20 = vld [vmem:[%s2471_s6] sm:$0x3]  ;;  %vm1037_vm11 = vcmask 908288   ;;  %s350_s10 = sand.u32 1, %s1803_s25  }
  0x1b   : > { %881 = vperm.xlu0 %1671, %v1571_v6   ;;  %1556 = vmatprep.subr.msk.mxu0 %vm389_vm0, %v384_v10  ;;  %v1977_v21 = vrot.slane %v764_v20, %v772_v16  ;;  %v1979_v22 = vrot.slane %v764_v20, %v768_v7  ;;  %v1573_v24 = vld [vmem:[%s2470_s5 + $0x20] sm:$0xff]  ;;  %vm1112_vm12 = vcmask 900096   ;;  %vm1190_vm13 = vcmask 785408   ;;  %s1552_s12 = sshll.u32 %s350_s10, 4 }
  0x1c   : > { %862 = vrot.lane.b32.xlu1 %v857_v9, %s1823_s19  ;;  %1557 = vmatpush1.msk.msra.mxu0 %vm389_vm0, %v381_v8  ;;  %v1577_v27 = vld [vmem:[%s2470_s5 + $0x40] sm:$0xff]  ;;  %vm1253_vm14 = vcmask 777216   ;;  %vm1328_vm15 = vcmask 769024   ;;  %s352_s16 = scalar_lea.vmem [#allocation2], %s1552_s12 }
  0x1d   : > { %1559 = vmatprep.subr.msk.mxu1 %vm389_vm0, %v468_v12  ;;  %1558 = vmatmul.mubr.msk.f32.vlgmr.msra.gmra.mxu0 %vm385_vm1, %v382_v13  ;;  %v780_v28 = vld [vmem:[%s2470_s5] sm:$0xff]  ;;  %s1401_s17 = sshll.u32 %s352_s16, 4  ;;  %s1402_s17 = int_to_ptr.vmem [resolvable:$true] %s1401_s17 }
  0x1e   : > { %1560 = vmatpush1.msk.msra.mxu1 %vm389_vm0, %v379_v11  ;;  %1589 = vmatprep.subr.mxu0 %v1821_v1 }
  0x1f   : > { %1561 = vmatmul.mubr.msk.f32.vlgmr.msra.gmra.mxu1 %vm385_vm1, %v465_v14  ;;  %1590 = vmatpush3.msk.msra.mxu0 %vm389_vm0, %v380_v15 }
  0x20   : > { %1591 = vmatprep.mubr.msk.f32.mxu0 %vm1824_vm2, %v1821_v1  ;;  %1564 = vmatprep.subr.msk.mxu1 %vm389_vm0, %v468_v12 }
  0x21   : > { %687 = vmatprep.mubr.f32.mxu1 %v1821_v1  ;;  %1592 = vmatmul.mubr.msk.f32.vlgmr.msra.gmra.mxu0 %vm385_vm1, %v465_v14 }
  0x22   : > { %1565 = vmatpush1.msk.msra.mxu1 %vm389_vm0, %v379_v11  ;;  %1594 = vmatprep.subr.mxu0 %v1821_v1 }
  0x23   : > { %1566 = vmatmul.mubr.msk.f32.vlgmr.msra.gmra.mxu1 %vm385_vm1, %v619_v17  ;;  %1595 = vmatpush3.msk.msra.mxu0 %vm389_vm0, %v380_v15 }
  0x24   : > { %1596 = vmatprep.mubr.msk.f32.mxu0 %vm1824_vm2, %v1821_v1  ;;  %959 = vperm.xlu0 %1671, %v1572_v19  }
  0x25   : > { %864 = vrot.lane.b32.xlu1 %v861_v18, %s1823_s19  ;;  %1597 = vmatmul.mubr.msk.f32.vlgmr.msra.gmra.mxu0 %vm385_vm1, %v619_v17  ;;  %s1826_s19 = smov 18  }
  0x28   : > { %942 = vrot.lane.b32.xlu0 %v1977_v21, %s1825_s15 }
  0x29   : > { %940 = vrot.lane.b32.xlu1 %v1979_v22, %s1825_s15  ;;  %s1828_s15 = smov 34  }
  0x2c   : > { %1097 = vperm.xlu0 %1671, %v1574_v23  }
  0x2d   : > { %1022 = vperm.xlu1 %1672, %v1573_v24  }
  0x30   : > { %1080 = vrot.lane.b32.xlu0 %v861_v18, %s1826_s19 }
  0x31   : > { %1078 = vrot.lane.b32.xlu1 %v857_v9, %s1826_s19  ;;  %s1831_s19 = smov 112  }
  0x34   : > { %1156 = vrot.lane.b32.xlu0 %v1979_v22, %s1827_s23 }
  0x35   : > { %1175 = vperm.xlu1 %1672, %v1575_v25  }
  0x38   : > { %1238 = vperm.xlu0 %1671, %v1576_v26  }
  0x39   : > { %1158 = vrot.lane.b32.xlu1 %v1977_v21, %s1827_s23  ;;  %s1834_s23 = smov 96  }
  0x3c   : > { %1294 = vrot.lane.b32.xlu0 %v857_v9, %s1828_s15 }
  0x3d   : > { %1313 = vperm.xlu1 %1672, %v1577_v27  }
  0x40   : > { %783 = vperm.xlu0 %1671, %v780_v28  }
  0x41   : > { %1296 = vrot.lane.b32.xlu1 %v861_v18, %s1828_s15  ;;  %s1584_s15 = sshll.u32 %s1811_s27, 8 }
  0x8e   : > { %v2004_v30 = vpop.permute.xlu1 %862 }
  0x92   : > { %v795_v29 = vpop.permute.xlu0 %794 }
  0x96   : > { %v2006_v31 = vpop.permute.xlu0 %881 }
  0x97   : > { %v2008_v32 = vpop.permute.xlu1 %864 }
  0x98   : > { %v2068_v63 = vsel %vm866_vm5, %v2004_v30, %v2008_v32 }
  0x9b   : > { %v2012_v34 = vpop.permute.xlu1 %940 }
  0x9f   : > { %v2010_v33 = vpop.permute.xlu0 %959 }
  0xa3   : > { %v2014_v35 = vpop.permute.xlu0 %942 }
  0xa4   : > { %v2054_v58 = vsel %vm944_vm3, %v2012_v34, %v2014_v35 }
  0xa7   : > { %v2032_v45 = vpop.permute.xlu0 %1097 }
  0xa8   : > { %v1023_v36 = vpop.permute.xlu1 %1022 }
  0xab   : > { %v2048_v56 = vpop.permute.xlu0 %1080 }
  0xac   : > { %v2034_v46 = vpop.permute.xlu1 %1078 }
  0xad   : > { %v2062_v62 = vsel %vm1082_vm4, %v2034_v46, %v2048_v56 }
  0xaf   : > { %v2070_v0 = vpop.permute.xlu0 %1156 }
  0xb0   : > { %v1176_v57 = vpop.permute.xlu1 %1175 }
  0xb3   : > { %v1239_v15 = vpop.permute.xlu0 %1238 }
  0xb4   : > { %v2072_v1 = vpop.permute.xlu1 %1158 }
  0xb5   : > { %v2082_v6 = vsel %vm1160_vm6, %v2070_v0, %v2072_v1 }
  0xb7   : > { %v1295_v19 = vpop.permute.xlu0 %1294 }
  0xb8   : > { %v1314_v16 = vpop.permute.xlu1 %1313 }
  0xbc   : > { %v1297_v26 = vpop.permute.xlu1 %1296 }
  0xdd   : > { %v2016_v37 = vpop.f32.mrf.mxu0 }
  0xdf   : > { %v2018_v38 = vpop.f32.mrf.mxu1  ;;  %v2020_v39 = vpop.f32.mrf.mxu0 }
  0xe0   : > { %v1025_v40 = vadd.f32 %v1023_v36, %v2018_v38  ;;  %v797_v41 = vadd.f32 %v795_v29, %v2018_v38  ;;  %v949_v42 = vmul.f32 %v2012_v34, %v2018_v38  ;;  %v871_v50 = vmul.f32 %v2004_v30, %v2018_v38 }
  0xe1   : > { %v2026_v43 = vpop.f32.mrf.mxu1  ;;  %v2028_v44 = vpop.f32.mrf.mxu0  ;;  %v1087_v54 = vmul.f32 %v2034_v46, %v2018_v38  ;;  %v1165_v14 = vmul.f32 %v2070_v0, %v2018_v38  ;;  %v1241_v20 = vadd.f32 %v1239_v15, %v2018_v38  ;;  %v1303_v25 = vmul.f32 %v1295_v19, %v2018_v38 }
  0xe2   : > { %1031 = vrot.lane.b32.xlu0 %v1025_v40, %s1829_s18  ;;  %803 = vrot.lane.b32.xlu1 %v797_v41, %s1830_s20  ;;  %v962_v48 = vadd.f32 %v2010_v33, %v949_v42  ;;  %v798_v49 = vadd.f32 %v795_v29, %v2026_v43  ;;  %v1026_v52 = vadd.f32 %v1023_v36, %v2026_v43 }
  0xe3   : > { %v1593_v47 = vpop.f32.mrf.mxu0  ;;  %v884_v53 = vadd.f32 %v2006_v31, %v871_v50  ;;  %v1100_v59 = vadd.f32 %v2032_v45, %v1087_v54  ;;  %v1027_v60 = vadd.f32 %v1023_v36, %v2028_v44  ;;  %v950_v61 = vmul.f32 %v2054_v58, %v2026_v43  ;;  %v2118_v41 = vpop.f32.mrf.mxu1 }
  0xe4   : > { %v799_v2 = vadd.f32 %v795_v29, %v2028_v44  ;;  %v872_v4 = vmul.f32 %v2068_v63, %v2026_v43  ;;  %v1088_v5 = vmul.f32 %v2062_v62, %v2026_v43  ;;  %v1166_v9 = vmul.f32 %v2082_v6, %v2026_v43 }
  0xe5   : > { %v2040_v51 = vpop.f32.mrf.mxu0  ;;  %v963_v3 = vadd.f32 %v2010_v33, %v950_v61  ;;  %v873_v10 = vmul.f32 %v2008_v32, %v2028_v44  ;;  %v951_v13 = vmul.f32 %v2014_v35, %v2028_v44  ;;  %v1178_v18 = vadd.f32 %v1176_v57, %v1165_v14  ;;  %v2123_v47 = vpop.f32.mrf.mxu1 }
  0xe6   : > { %968 = vrot.lane.b32.xlu1 %v962_v48, %s1831_s19  ;;  %805 = vrot.lane.b32.xlu0 %v798_v49, %s1830_s20  ;;  %v885_v7 = vadd.f32 %v2006_v31, %v872_v4  ;;  %v1101_v8 = vadd.f32 %v2032_v45, %v1088_v5  ;;  %v1179_v11 = vadd.f32 %v1176_v57, %v1166_v9 }
  0xe7   : > { %v1598_v55 = vpop.f32.mrf.mxu0  ;;  %v886_v12 = vadd.f32 %v2006_v31, %v873_v10  ;;  %v964_v17 = vadd.f32 %v2010_v33, %v951_v13  ;;  %v1242_v23 = vadd.f32 %v1239_v15, %v2026_v43  ;;  %v1089_v24 = vmul.f32 %v2048_v56, %v2028_v44 }
  0xe8   : > { %v1316_v28 = vadd.f32 %v1314_v16, %v1303_v25  ;;  %v1167_v29 = vmul.f32 %v2072_v1, %v2028_v44  ;;  %v1299_v31 = vsel %vm1298_vm7, %v1295_v19, %v1297_v26  ;;  %v1243_v33 = vadd.f32 %v1239_v15, %v2028_v44 }
  0xe9   : > { %v1102_v27 = vadd.f32 %v2032_v45, %v1089_v24  ;;  %v1304_v40 = vmul.f32 %v1299_v31, %v2026_v43  ;;  %v1305_v45 = vmul.f32 %v1297_v26, %v2028_v44  ;;  %v952_v49 = vmul.f32 %v2012_v34, %v2118_v41 }
  0xea   : > { %1033 = vrot.lane.b32.xlu1 %v1026_v52, %s1829_s18  ;;  %890 = vrot.lane.b32.xlu0 %v884_v53, %s1832_s22  ;;  %v1180_v36 = vadd.f32 %v1176_v57, %v1167_v29  ;;  %v874_v50 = vmul.f32 %v2004_v30, %v2118_v41  ;;  %v1090_v44 = vmul.f32 %v2034_v46, %v2118_v41 }
  0xeb   : > { %v1317_v42 = vadd.f32 %v1314_v16, %v1304_v40  ;;  %v1318_v48 = vadd.f32 %v1314_v16, %v1305_v45  ;;  %v953_v30 = vmul.f32 %v2054_v58, %v2123_v47  ;;  %v876_v34 = vmul.f32 %v2008_v32, %v2040_v51 }
  0xec   : > { %v875_v52 = vmul.f32 %v2068_v63, %v2123_v47  ;;  %v1091_v46 = vmul.f32 %v2062_v62, %v2123_v47  ;;  %v954_v53 = vmul.f32 %v2014_v35, %v2040_v51  ;;  %v1168_v32 = vmul.f32 %v2070_v0, %v2118_v41 }
  0xed   : > { %v1169_v54 = vmul.f32 %v2082_v6, %v2123_v47  ;;  %v1092_v55 = vmul.f32 %v2048_v56, %v2040_v51  ;;  %v1170_v35 = vmul.f32 %v2072_v1, %v2040_v51  ;;  %v1306_v57 = vmul.f32 %v1295_v19, %v2118_v41 }
  0xee   : > { %1106 = vrot.lane.b32.xlu1 %v1100_v59, %s1833_s21  ;;  %1035 = vrot.lane.b32.xlu0 %v1027_v60, %s1829_s18  ;;  %v1308_v56 = vmul.f32 %v1297_v26, %v2040_v51  ;;  %v1307_v58 = vmul.f32 %v1299_v31, %v2123_v47  ;;  %v784_v59 = vpop.permute.xlu0 %783 }
  0xf2   : > { %807 = vrot.lane.b32.xlu1 %v799_v2, %s1830_s20  ;;  %970 = vrot.lane.b32.xlu0 %v963_v3, %s1831_s19  ;;  %v777_v2 = vmul.f32 %v1977_v21, %v2026_v43 }
  0xf4   : > { %v787_v5 = vadd.f32 %v784_v59, %v777_v2 }
  0xf6   : > { %892 = vrot.lane.b32.xlu1 %v885_v7, %s1832_s22  ;;  %1108 = vrot.lane.b32.xlu0 %v1101_v8, %s1833_s21 }
  0xfa   : > { %1186 = vrot.lane.b32.xlu1 %v1179_v11, %s1834_s23  ;;  %894 = vrot.lane.b32.xlu0 %v886_v12, %s1832_s22  ;;  %v789_v12 = vmul.f32 %v787_v5, %v2020_v39 }
  0xfe   : > { %972 = vrot.lane.b32.xlu1 %v964_v17, %s1831_s19  ;;  %1184 = vrot.lane.b32.xlu0 %v1178_v18, %s1834_s23 }
 0x102   : > { %1247 = vrot.lane.b32.xlu1 %v1241_v20, %s1835_s30  ;;  %1249 = vrot.lane.b32.xlu0 %v1242_v23, %s1835_s30 }
 0x106   : > { %1110 = vrot.lane.b32.xlu1 %v1102_v27, %s1833_s21  ;;  %1322 = vrot.lane.b32.xlu0 %v1316_v28, %s1836_s8 }
 0x10a   : > { %1251 = vrot.lane.b32.xlu1 %v1243_v33, %s1835_s30  ;;  %1188 = vrot.lane.b32.xlu0 %v1180_v36, %s1834_s23 }
 0x10e   : > { %1324 = vrot.lane.b32.xlu1 %v1317_v42, %s1836_s8  ;;  %839 = vrot.lane.b32.xlu0 %v2123_v47, %s1830_s20 }
 0x112   : > { %837 = vrot.lane.b32.xlu1 %v2118_v41, %s1830_s20  ;;  %1326 = vrot.lane.b32.xlu0 %v1318_v48, %s1836_s8 }
 0x116   : > { %1004 = vrot.lane.b32.xlu1 %v952_v49, %s1831_s19  ;;  %926 = vrot.lane.b32.xlu0 %v874_v50, %s1832_s22 }
 0x11a   : > { %1066 = vrot.lane.b32.xlu1 %v2123_v47, %s1829_s18  ;;  %1064 = vrot.lane.b32.xlu0 %v2118_v41, %s1829_s18 }
 0x11e   : > { %1142 = vrot.lane.b32.xlu1 %v1090_v44, %s1833_s21  ;;  %1068 = vrot.lane.b32.xlu0 %v2040_v51, %s1829_s18 }
 0x122   : > { %841 = vrot.lane.b32.xlu1 %v2040_v51, %s1830_s20  ;;  %1006 = vrot.lane.b32.xlu0 %v953_v30, %s1831_s19 }
 0x126   : > { %930 = vrot.lane.b32.xlu0 %v876_v34, %s1832_s22  ;;  %928 = vrot.lane.b32.xlu1 %v875_v52, %s1832_s22  ;;  %s1385_s22 = scalar_lea.sflag [#allocation3], %s350_s10 }
 0x12a   : > { %1144 = vrot.lane.b32.xlu0 %v1091_v46, %s1833_s21  ;;  %1008 = vrot.lane.b32.xlu1 %v954_v53, %s1831_s19  ;;  %s1399_s19 = scalar_lea.hbm %s2472_s7, %s1584_s15 }
 0x12e   : > { %1220 = vrot.lane.b32.xlu0 %v1168_v32, %s1834_s23  ;;  %1222 = vrot.lane.b32.xlu1 %v1169_v54, %s1834_s23 }
 0x132   : > { %1282 = vrot.lane.b32.xlu0 %v2123_v47, %s1835_s30  ;;  %1146 = vrot.lane.b32.xlu1 %v1092_v55, %s1833_s21  ;;  %s1743_s21 = scalar_lea.vmem %s1402_s17, 256 }
 0x133   : > { %p1744_p12 = scmp.ne.s32.totalorder %s1402_s17, %s1743_s21 }
 0x135   : > { %p1745_p13 = pnand %p1744_p12, %p1918_p4 }
 0x136   : > { %1224 = vrot.lane.b32.xlu0 %v1170_v35, %s1834_s23  ;;  %1280 = vrot.lane.b32.xlu1 %v2118_v41, %s1835_s30  ;;  %s1837_s23 = smov [#allocation2]  }
 0x137   : > { %p1746_p0 = pneg %p1745_p13 }
 0x13a   : > { %1358 = vrot.lane.b32.xlu0 %v1306_v57, %s1836_s8  ;;  %1284 = vrot.lane.b32.xlu1 %v2040_v51, %s1835_s30  ;;  %v776_v51 = vmul.f32 %v1979_v22, %v2018_v38  ;;  %s1747_s30 = sshll.u32 %s1837_s23, 4  ;;  %s1748_s30 = int_to_ptr.vmem [resolvable:$false] %s1747_s30 }
 0x13b   : > { %s1749_s27 = scalar_lea.vmem %s1748_s30, 512  ;;  %p1750_p1 = scmp.lt.s32.totalorder %s1402_s17, %s1748_s30 }
 0x13c   : > { %v786_v7 = vadd.f32 %v784_v59, %v776_v51  ;;  %p1751_p2 = scmp.lt.s32.totalorder %s1749_s27, %s1743_s21 }
 0x13e   : > { %1362 = vrot.lane.b32.xlu0 %v1308_v56, %s1836_s8  ;;  %1360 = vrot.lane.b32.xlu1 %v1307_v58, %s1836_s8  ;;  %v788_v38 = vmul.f32 %v786_v7, %v2016_v37  ;;  %p1752_p3 = por %p1751_p2, %p1750_p1 }
 0x140   : > { %p1753_p5 = pnand %p1752_p3, %p1746_p0 }
 0x154   : > { %v1032_v60 = vpop.permute.xlu0 %1031  ;;  %v804_v61 = vpop.permute.xlu1 %803 }
 0x158   : > { %v969_v62 = vpop.permute.xlu1 %968  ;;  %v806_v63 = vpop.permute.xlu0 %805 }
 0x159   : > { %v810_v6 = vsel %vm809_vm8, %v804_v61, %v806_v63 }
 0x15a   : > { %v814_v11 = vmul.f32 %v810_v6, %v2016_v37 }
 0x15c   : > { %v2187_v0 = vpop.permute.xlu1 %1033  ;;  %v891_v1 = vpop.permute.xlu0 %890  ;;  %v816_v17 = vmax.f32 %v788_v38, %v814_v11 }
 0x15d   : > { %v1038_v44 = vsel %vm1037_vm11, %v1032_v60, %v2187_v0 }
 0x15e   : > { %v818_v26 = vsub.f32 %v788_v38, %v816_v17  ;;  %v824_v29 = vsub.f32 %v814_v11, %v816_v17  ;;  %v2222_v57 = vmul.f32 %v1038_v44, %v2016_v37 }
 0x160   : > { %v1107_v3 = vpop.permute.xlu1 %1106  ;;  %v1036_v4 = vpop.permute.xlu0 %1035  ;;  %v820_v49 = vmul.f32 1.442695, %v818_v26  ;;  %v826_v52 = vmul.f32 1.442695, %v824_v29 }
 0x161   : > { %v1039_v60 = vsel %vm1037_vm11, %v2187_v0, %v1036_v4 }
 0x164   : > { %v808_v8 = vpop.permute.xlu1 %807  ;;  %v971_v9 = vpop.permute.xlu0 %970 }
 0x165   : > { %v811_v10 = vsel %vm809_vm8, %v806_v63, %v808_v8  ;;  %v975_v27 = vsel %vm974_vm10, %v969_v62, %v971_v9 }
 0x166   : > { %v815_v43 = vmul.f32 %v811_v10, %v2020_v39  ;;  %v2211_v50 = vmul.f32 %v975_v27, %v2016_v37 }
 0x168   : > { %v817_v13 = vmax.f32 %v789_v12, %v815_v43  ;;  %v893_v14 = vpop.permute.xlu1 %892  ;;  %v1109_v15 = vpop.permute.xlu0 %1108 }
 0x169   : > { %v897_v16 = vsel %vm896_vm9, %v891_v1, %v893_v14  ;;  %v1113_v58 = vsel %vm1112_vm12, %v1107_v3, %v1109_v15  ;;  %v2235_v3 = vmul.f32 %v1039_v60, %v2020_v39 }
 0x16a   : > { %v819_v18 = vsub.f32 %v789_v12, %v817_v13  ;;  %v2201_v19 = vmul.f32 %v897_v16, %v2016_v37  ;;  %v825_v24 = vsub.f32 %v815_v43, %v817_v13  ;;  %v1117_v51 = vmul.f32 %v1113_v58, %v2016_v37 }
 0x16c   : > { %v2203_v20 = vpop.permute.xlu1 %1186  ;;  %v895_v23 = vpop.permute.xlu0 %894  ;;  %v822_v31 = vmul.f32 1.442695, %v819_v18  ;;  %v903_v33 = vmax.f32 %v816_v17, %v2201_v19  ;;  %v828_v42 = vmul.f32 1.442695, %v825_v24 }
 0x16d   : > { %v898_v25 = vsel %vm896_vm9, %v893_v14, %v895_v23 }
 0x16e   : > { %v902_v28 = vmul.f32 %v898_v25, %v2020_v39  ;;  %1675 = vpow2.f32 %v822_v31  ;;  %v2217_v46 = vmax.f32 %v903_v33, %v2211_v50  ;;  %v905_v56 = vsub.f32 %v816_v17, %v903_v33 }
 0x16f   : > { %1677 = vpow2.f32 %v828_v42  ;;  %v911_v5 = vsub.f32 %v2201_v19, %v903_v33 }
 0x170   : > { %v973_v36 = vpop.permute.xlu1 %972  ;;  %v1185_v40 = vpop.permute.xlu0 %1184  ;;  %v904_v45 = vmax.f32 %v817_v13, %v902_v28  ;;  %1679 = vpow2.f32 %v820_v49  ;;  %v2229_v61 = vmax.f32 %v2217_v46, %v2222_v57  ;;  %v907_v2 = vmul.f32 1.442695, %v905_v56 }
 0x171   : > { %v976_v48 = vsel %vm974_vm10, %v971_v9, %v973_v36  ;;  %v983_v4 = vsub.f32 %v903_v33, %v2217_v46  ;;  %v1191_v12 = vsel %vm1190_vm13, %v1185_v40, %v2203_v20  ;;  %v2275_v36 = vmul.f32 %v1979_v22, %v2118_v41 }
 0x172   : > { %v906_v30 = vsub.f32 %v817_v13, %v904_v45  ;;  %v980_v34 = vmul.f32 %v976_v48, %v2020_v39  ;;  %v912_v55 = vsub.f32 %v902_v28, %v904_v45  ;;  %v2241_v7 = vmax.f32 %v2229_v61, %v1117_v51 }
 0x173   : > { %v1046_v43 = vsub.f32 %v2217_v46, %v2229_v61  ;;  %v913_v13 = vmul.f32 1.442695, %v911_v5  ;;  %v985_v14 = vmul.f32 1.442695, %v983_v4  ;;  %v2254_v16 = vmul.f32 %v1191_v12, %v2016_v37 }
 0x174   : > { %v1248_v53 = vpop.permute.xlu1 %1247  ;;  %v2219_v32 = vpop.permute.xlu0 %1249  ;;  %v909_v54 = vmul.f32 1.442695, %v906_v30  ;;  %v982_v35 = vmax.f32 %v904_v45, %v980_v34  ;;  %v915_v1 = vmul.f32 1.442695, %v912_v55 }
 0x175   : > { %v1254_v26 = vsel %vm1253_vm14, %v1248_v53, %v2219_v32  ;;  %v1048_v28 = vmul.f32 1.442695, %v1046_v43 }
 0x176   : > { %1681 = vpow2.f32 %v909_v54  ;;  %v984_v59 = vsub.f32 %v904_v45, %v982_v35  ;;  %v990_v10 = vsub.f32 %v980_v34, %v982_v35  ;;  %v1045_v11 = vmax.f32 %v982_v35, %v2235_v3 }
 0x177   : > { %1683 = vpow2.f32 %v826_v52  ;;  %v2281_v45 = vmax.f32 %v2241_v7, %v2254_v16  ;;  %v2284_v48 = vmul.f32 %v1254_v26, %v2016_v37 }
 0x178   : > { %v1111_v62 = vpop.permute.xlu1 %1110  ;;  %v2231_v63 = vpop.permute.xlu0 %1322  ;;  %v987_v6 = vmul.f32 1.442695, %v984_v59  ;;  %1685 = vpow2.f32 %v915_v1  ;;  %v993_v24 = vmul.f32 1.442695, %v990_v10  ;;  %v1047_v25 = vsub.f32 %v982_v35, %v1045_v11 }
 0x179   : > { %v1114_v0 = vsel %vm1112_vm12, %v1109_v15, %v1111_v62  ;;  %1687 = vpow2.f32 %v907_v2  ;;  %v1121_v15 = vsub.f32 %v2229_v61, %v2241_v7  ;;  %v1053_v53 = vsub.f32 %v2235_v3, %v1045_v11 }
 0x17a   : > { %v2249_v38 = vmul.f32 %v1114_v0, %v2020_v39  ;;  %1689 = vpow2.f32 %v987_v6  ;;  %v1050_v22 = vmul.f32 1.442695, %v1047_v25  ;;  %v1199_v59 = vsub.f32 %v2241_v7, %v2281_v45 }
 0x17b   : > { %v2260_v23 = vpop.eup %1675  ;;  %1691 = vpow2.f32 %v913_v13  ;;  %v1123_v42 = vmul.f32 1.442695, %v1121_v15  ;;  %v2301_v60 = vmax.f32 %v2281_v45, %v2284_v48  ;;  %v1056_v4 = vmul.f32 1.442695, %v1053_v53 }
 0x17c   : > { %v1252_v8 = vpop.permute.xlu1 %1251  ;;  %v1189_v9 = vpop.permute.xlu0 %1188  ;;  %v1120_v29 = vmax.f32 %v1045_v11, %v2249_v38  ;;  %1693 = vpow2.f32 %v985_v14  ;;  %v1205_v10 = vsub.f32 %v2254_v16, %v2281_v45 }
 0x17d   : > { %v1192_v17 = vsel %vm1190_vm13, %v2203_v20, %v1189_v9  ;;  %v2264_v27 = vpop.eup %1677  ;;  %v1127_v20 = vsub.f32 %v1117_v51, %v2241_v7  ;;  %1695 = vpow2.f32 %v993_v24  ;;  %v1255_v52 = vsel %vm1253_vm14, %v2219_v32, %v1252_v8 }
 0x17e   : > { %v2267_v31 = vpop.eup %1679  ;;  %v2271_v33 = vmul.f32 %v1192_v17, %v2020_v39  ;;  %v831_v34 = vadd.f32 %v2264_v27, %v2260_v23  ;;  %1697 = vpow2.f32 %v1048_v28  ;;  %v1122_v41 = vsub.f32 %v1045_v11, %v1120_v29 }
 0x17f   : > { %v1129_v54 = vmul.f32 1.442695, %v1127_v20  ;;  %1699 = vpow2.f32 %v1123_v42  ;;  %v2308_v1 = vmul.f32 %v1255_v52, %v2020_v39  ;;  %v1052_v51 = vsub.f32 %v2222_v57, %v2229_v61 }
 0x180   : > { %v1325_v18 = vpop.permute.xlu1 %1324  ;;  %v2258_v19 = vpop.permute.xlu0 %839  ;;  %v2293_v35 = vmax.f32 %v1120_v29, %v2271_v33  ;;  %1701 = vpow2.f32 %v1050_v22  ;;  %v1125_v5 = vmul.f32 1.442695, %v1122_v41  ;;  %v1128_v6 = vsub.f32 %v2249_v38, %v1120_v29 }
 0x181   : > { %v1329_v2 = vsel %vm1328_vm15, %v2231_v63, %v1325_v18  ;;  %1703 = vpow2.f32 %v1129_v54  ;;  %v989_v63 = vsub.f32 %v2211_v50, %v2217_v46  ;;  %v1201_v61 = vmul.f32 1.442695, %v1199_v59 }
 0x182   : > { %v1200_v9 = vsub.f32 %v1120_v29, %v2293_v35  ;;  %v2333_v11 = vmul.f32 %v1329_v2, %v2016_v37  ;;  %v1262_v38 = vsub.f32 %v2281_v45, %v2301_v60  ;;  %v1054_v50 = vmul.f32 1.442695, %v1052_v51 }
 0x183   : > { %v2277_v40 = vpop.eup %1681  ;;  %1705 = vpow2.f32 %v1056_v4  ;;  %v991_v46 = vmul.f32 1.442695, %v989_v63  ;;  %v1131_v13 = vmul.f32 1.442695, %v1128_v6  ;;  %v1206_v17 = vsub.f32 %v2271_v33, %v2293_v35 }
 0x184   : > { %v838_v49 = vpop.permute.xlu1 %837  ;;  %v1327_v44 = vpop.permute.xlu0 %1326  ;;  %v918_v55 = vmul.f32 %v2277_v40, %v831_v34  ;;  %1707 = vpow2.f32 %v1125_v5  ;;  %v1203_v16 = vmul.f32 1.442695, %v1200_v9  ;;  %v1207_v25 = vmul.f32 1.442695, %v1205_v10 }
 0x185   : > { %v1684_v30 = vpop.eup %1683  ;;  %v1330_v56 = vsel %vm1328_vm15, %v1325_v18, %v1327_v44  ;;  %v843_v14 = vsel %vm809_vm8, %v838_v49, %v2258_v19  ;;  %1709 = vpow2.f32 %v991_v46  ;;  %v1335_v26 = vmax.f32 %v2301_v60, %v2333_v11 }
 0x186   : > { %v830_v58 = vadd.f32 %v1684_v30, %v2267_v31  ;;  %v2314_v3 = vpop.eup %1685  ;;  %v2318_v0 = vmul.f32 %v1330_v56, %v2020_v39  ;;  %v1261_v39 = vmax.f32 %v2293_v35, %v2308_v1  ;;  %1711 = vpow2.f32 %v1201_v61 }
 0x187   : > { %v2320_v7 = vpop.eup %1687  ;;  %v920_v8 = vadd.f32 %v2314_v3, %v918_v55  ;;  %v1268_v42 = vsub.f32 %v2284_v48, %v2301_v60  ;;  %v847_v45 = vmul.f32 %v1684_v30, %v843_v14  ;;  %1713 = vpow2.f32 %v1054_v50 }
 0x188   : > { %v2303_v32 = vpop.permute.xlu1 %1004  ;;  %v2305_v62 = vpop.permute.xlu0 %926  ;;  %v2344_v15 = vmax.f32 %v1261_v39, %v2318_v0  ;;  %v917_v24 = vmul.f32 %v2320_v7, %v830_v58  ;;  %v1263_v33 = vsub.f32 %v2293_v35, %v1261_v39  ;;  %v1264_v44 = vmul.f32 1.442695, %v1262_v38 }
 0x189   : > { %v2326_v57 = vpop.eup %1689  ;;  %1715 = vpow2.f32 %v1131_v13  ;;  %v832_v34 = vmul.f32 %v2267_v31, %v2275_v36  ;;  %v1209_v53 = vmul.f32 1.442695, %v1206_v17  ;;  %v1269_v48 = vsub.f32 %v2308_v1, %v1261_v39 }
 0x18a   : > { %v996_v37 = vmul.f32 %v2326_v57, %v920_v8  ;;  %v1692_v18 = vpop.eup %1691  ;;  %v1338_v22 = vsub.f32 %v1261_v39, %v2344_v15  ;;  %1717 = vpow2.f32 %v1203_v16  ;;  %v1337_v30 = vsub.f32 %v2301_v60, %v1335_v26 }
 0x18b   : > { %v2356_v20 = vpop.eup %1693  ;;  %v919_v54 = vadd.f32 %v1692_v18, %v917_v24  ;;  %1719 = vpow2.f32 %v1207_v25  ;;  %v779_v35 = vmul.f32 %v1977_v21, %v2123_v47  ;;  %v1270_v36 = vmul.f32 1.442695, %v1268_v42 }
 0x18c   : > { %v2335_v12 = vpop.permute.xlu1 %1066  ;;  %v2337_v43 = vpop.permute.xlu0 %1064  ;;  %v1266_v58 = vmul.f32 1.442695, %v1263_v33  ;;  %v849_v59 = vadd.f32 %v847_v45, %v832_v34  ;;  %1721 = vpow2.f32 %v1264_v44  ;;  %v1341_v1 = vmul.f32 1.442695, %v1338_v22 }
 0x18d   : > { %v2361_v49 = vpop.eup %1695  ;;  %v833_v5 = vmul.f32 %v2260_v23, %v779_v35  ;;  %1723 = vpow2.f32 %v1209_v53  ;;  %v1344_v21 = vsub.f32 %v2318_v0, %v2344_v15  ;;  %v1272_v47 = vmul.f32 1.442695, %v1269_v48 }
 0x18e   : > { %v2366_v41 = vpop.eup %1697  ;;  %v998_v52 = vadd.f32 %v2361_v49, %v996_v37  ;;  %v995_v8 = vmul.f32 %v2356_v20, %v919_v54  ;;  %v1343_v9 = vsub.f32 %v2333_v11, %v1335_v26  ;;  %1725 = vpow2.f32 %v1266_v58 }
 0x18f   : > { %v2373_v31 = vpop.eup %1699  ;;  %v921_v23 = vmul.f32 %v2320_v7, %v849_v59  ;;  %1727 = vpow2.f32 %v1341_v1  ;;  %v1347_v11 = vmul.f32 1.442695, %v1344_v21 }
 0x190   : > { %v2352_v28 = vpop.permute.xlu1 %1142  ;;  %v2354_v29 = vpop.permute.xlu0 %1068  ;;  %1729 = vpow2.f32 %v1272_v47  ;;  %v1345_v37 = vmul.f32 1.442695, %v1343_v9 }
 0x191   : > { %v2377_v51 = vpop.eup %1701  ;;  %1731 = vpow2.f32 %v1270_v36  ;;  %v1071_v34 = vsel %vm1037_vm11, %v2335_v12, %v2354_v29 }
 0x192   : > { %v1059_v6 = vmul.f32 %v2377_v51, %v998_v52  ;;  %v2384_v4 = vpop.eup %1703 }
 0x193   : > { %v1706_v0 = vpop.eup %1705 }
 0x194   : > { %v842_v55 = vpop.permute.xlu1 %841  ;;  %v1007_v56 = vpop.permute.xlu0 %1006  ;;  %v1061_v15 = vadd.f32 %v1706_v0, %v1059_v6 }
 0x195   : > { %v844_v2 = vsel %vm809_vm8, %v2258_v19, %v842_v55  ;;  %v1339_v19 = vmul.f32 1.442695, %v1337_v30  ;;  %v1708_v13 = vpop.eup %1707  ;;  %v1010_v14 = vsel %vm974_vm10, %v2303_v32, %v1007_v56 }
 0x196   : > { %v848_v60 = vmul.f32 %v2264_v27, %v844_v2  ;;  %v1710_v7 = vpop.eup %1709 }
 0x197   : > { %v2396_v25 = vpop.eup %1711  ;;  %1733 = vpow2.f32 %v1339_v19  ;;  %v1014_v26 = vmul.f32 %v1710_v7, %v1010_v14 }
 0x198   : > { %v850_v63 = vadd.f32 %v848_v60, %v833_v5  ;;  %v931_v61 = vpop.permute.xlu0 %930  ;;  %v929_v10 = vpop.permute.xlu1 %928  ;;  %1735 = vpow2.f32 %v1347_v11 }
 0x199   : > { %v932_v27 = vsel %vm896_vm9, %v2305_v62, %v929_v10  ;;  %v933_v39 = vsel %vm896_vm9, %v929_v10, %v931_v61  ;;  %v1714_v32 = vpop.eup %1713  ;;  %1737 = vpow2.f32 %v1345_v37 }
 0x19a   : > { %v922_v38 = vmul.f32 %v2277_v40, %v850_v63  ;;  %v936_v50 = vmul.f32 %v1692_v18, %v932_v27  ;;  %v937_v46 = vmul.f32 %v2314_v3, %v933_v39  ;;  %v1070_v40 = vsel %vm1037_vm11, %v2337_v43, %v2335_v12  ;;  %v1716_v44 = vpop.eup %1715 }
 0x19b   : > { %v997_v3 = vadd.f32 %v1710_v7, %v995_v8  ;;  %v1134_v43 = vmul.f32 %v1708_v13, %v1061_v15  ;;  %v1718_v52 = vpop.eup %1717 }
 0x19c   : > { %v938_v62 = vadd.f32 %v936_v50, %v921_v23  ;;  %v939_v16 = vadd.f32 %v937_v46, %v922_v38  ;;  %v1145_v17 = vpop.permute.xlu0 %1144  ;;  %v1009_v24 = vpop.permute.xlu1 %1008 }
 0x19d   : > { %v1011_v18 = vsel %vm974_vm10, %v1007_v56, %v1009_v24  ;;  %v1058_v22 = vmul.f32 %v2366_v41, %v997_v3  ;;  %v1720_v55 = vpop.eup %1719  ;;  %v1136_v35 = vadd.f32 %v1716_v44, %v1134_v43  ;;  %v1075_v56 = vmul.f32 %v1706_v0, %v1071_v34 }
 0x19e   : > { %v999_v42 = vmul.f32 %v2356_v20, %v938_v62  ;;  %v1000_v33 = vmul.f32 %v2326_v57, %v939_v16  ;;  %v1015_v45 = vmul.f32 %v2361_v49, %v1011_v18  ;;  %v1074_v57 = vmul.f32 %v1714_v32, %v1070_v40  ;;  %v1722_v58 = vpop.eup %1721 }
 0x19f   : > { %v1060_v20 = vadd.f32 %v1714_v32, %v1058_v22  ;;  %v1212_v29 = vmul.f32 %v1718_v52, %v1136_v35  ;;  %v1724_v59 = vpop.eup %1723  ;;  %v1148_v6 = vsel %vm1112_vm12, %v2352_v28, %v1145_v17 }
 0x1a0   : > { %v1016_v53 = vadd.f32 %v1014_v26, %v999_v42  ;;  %v1017_v48 = vadd.f32 %v1015_v45, %v1000_v33  ;;  %v1221_v54 = vpop.permute.xlu0 %1220  ;;  %v1223_v30 = vpop.permute.xlu1 %1222  ;;  %v1152_v27 = vmul.f32 %v2384_v4, %v1148_v6 }
 0x1a1   : > { %v1133_v12 = vmul.f32 %v2373_v31, %v1060_v20  ;;  %v1726_v8 = vpop.eup %1725 }
 0x1a2   : > { %v1062_v49 = vmul.f32 %v2366_v41, %v1016_v53  ;;  %v1063_v36 = vmul.f32 %v2377_v51, %v1017_v48  ;;  %v1214_v41 = vadd.f32 %v1724_v59, %v1212_v29  ;;  %v1728_v63 = vpop.eup %1727 }
 0x1a3   : > { %v1135_v47 = vadd.f32 %v2384_v4, %v1133_v12  ;;  %v1730_v23 = vpop.eup %1729  ;;  %v1226_v4 = vsel %vm1190_vm13, %v1221_v54, %v1223_v30 }
 0x1a4   : > { %v1076_v2 = vadd.f32 %v1074_v57, %v1062_v49  ;;  %v1283_v1 = vpop.permute.xlu0 %1282  ;;  %v1147_v5 = vpop.permute.xlu1 %1146  ;;  %v1077_v60 = vadd.f32 %v1075_v56, %v1063_v36  ;;  %v1275_v10 = vmul.f32 %v1726_v8, %v1214_v41  ;;  %v1230_v33 = vmul.f32 %v1720_v55, %v1226_v4 }
 0x1a5   : > { %v1149_v21 = vsel %vm1112_vm12, %v1145_v17, %v1147_v5  ;;  %v1211_v61 = vmul.f32 %v2396_v25, %v1135_v47  ;;  %v1732_v38 = vpop.eup %1731 }
 0x1a6   : > { %v1137_v51 = vmul.f32 %v2373_v31, %v1076_v2  ;;  %v1138_v19 = vmul.f32 %v1708_v13, %v1077_v60  ;;  %v1153_v9 = vmul.f32 %v1716_v44, %v1149_v21  ;;  %v1277_v11 = vadd.f32 %v1730_v23, %v1275_v10  ;;  %v1734_v14 = vpop.eup %1733 }
 0x1a7   : > { %v1213_v46 = vadd.f32 %v1720_v55, %v1211_v61  ;;  %v1736_v62 = vpop.eup %1735 }
 0x1a8   : > { %v1155_v39 = vadd.f32 %v1153_v9, %v1138_v19  ;;  %v1225_v0 = vpop.permute.xlu0 %1224  ;;  %v1281_v28 = vpop.permute.xlu1 %1280  ;;  %v1154_v15 = vadd.f32 %v1152_v27, %v1137_v51  ;;  %v1350_v37 = vmul.f32 %v1728_v63, %v1277_v11 }
 0x1a9   : > { %v1227_v50 = vsel %vm1190_vm13, %v1223_v30, %v1225_v0  ;;  %v1274_v7 = vmul.f32 %v1722_v58, %v1213_v46  ;;  %v1738_v26 = vpop.eup %1737  ;;  %v1286_v53 = vsel %vm1253_vm14, %v1281_v28, %v1283_v1 }
 0x1aa   : > { %v1216_v31 = vmul.f32 %v1718_v52, %v1155_v39  ;;  %v1231_v13 = vmul.f32 %v1724_v59, %v1227_v50  ;;  %v1352_v24 = vadd.f32 %v1736_v62, %v1350_v37  ;;  %v1215_v40 = vmul.f32 %v2396_v25, %v1154_v15 }
 0x1ab   : > { %v1276_v17 = vadd.f32 %v1732_v38, %v1274_v7  ;;  %v1290_v30 = vmul.f32 %v1732_v38, %v1286_v53 }
 0x1ac   : > { %v1285_v16 = vpop.permute.xlu1 %1284  ;;  %v1233_v3 = vadd.f32 %v1231_v13, %v1216_v31  ;;  %v1359_v18 = vpop.permute.xlu0 %1358  ;;  %1739 = vrcp.f32 %v1352_v24  ;;  %v1232_v44 = vadd.f32 %v1230_v33, %v1215_v40 }
 0x1ad   : > { %v1349_v32 = vmul.f32 %v1734_v14, %v1276_v17  ;;  %v1287_v42 = vsel %vm1253_vm14, %v1283_v1, %v1285_v16 }
 0x1ae   : > { %v1279_v34 = vmul.f32 %v1726_v8, %v1233_v3  ;;  %v1291_v22 = vmul.f32 %v1730_v23, %v1287_v42  ;;  %v1278_v48 = vmul.f32 %v1722_v58, %v1232_v44 }
 0x1af   : > { %v1351_v45 = vadd.f32 %v1738_v26, %v1349_v32 }
 0x1b0   : > { %v1363_v43 = vpop.permute.xlu0 %1362  ;;  %v1361_v52 = vpop.permute.xlu1 %1360  ;;  %v1293_v25 = vadd.f32 %v1291_v22, %v1279_v34  ;;  %v1292_v20 = vadd.f32 %v1290_v30, %v1278_v48 }
 0x1b1   : > { %1741 = vrcp.f32 %v1351_v45  ;;  %v1365_v54 = vsel %vm1328_vm15, %v1361_v52, %v1363_v43  ;;  %v1364_v56 = vsel %vm1328_vm15, %v1359_v18, %v1361_v52 }
 0x1b2   : > { %v1354_v35 = vmul.f32 %v1728_v63, %v1293_v25  ;;  %v1369_v57 = vmul.f32 %v1736_v62, %v1365_v54  ;;  %v1353_v36 = vmul.f32 %v1734_v14, %v1292_v20  ;;  %v1368_v29 = vmul.f32 %v1738_v26, %v1364_v56 }
 0x1b4   : > { %v1371_v59 = vadd.f32 %v1369_v57, %v1354_v35  ;;  %v1370_v60 = vadd.f32 %v1368_v29, %v1353_v36 }
 0x1b9   : > { %v1740_v55 = vpop.eup %1739 }
 0x1ba   : > { %v1375_v49 = vmul.f32 %v1740_v55, %v1352_v24 }
 0x1bc   : > { %v1377_v12 = vsub.f32 2.0, %v1375_v49 }
 0x1be   : > { %v1742_v2 = vpop.eup %1741  ;;  %v1379_v1 = vmul.f32 %v1740_v55, %v1377_v12 }
 0x1bf   : > { %v1374_v58 = vmul.f32 %v1742_v2, %v1351_v45 }
 0x1c0   : > { %v1381_v6 = vmul.f32 %v1379_v1, %v1371_v59 }
 0x1c1   : > { %v1376_v5 = vsub.f32 2.0, %v1374_v58 }
 0x1c2   : > { %1383 = vst [vmem:[%s352_s16 + $0x8] sm:$0xff] %v1381_v6 }
 0x1c3   : > { %v1378_v21 = vmul.f32 %v1742_v2, %v1376_v5 }
 0x1c5   : > { %v1380_v47 = vmul.f32 %v1378_v21, %v1370_v60 }
 0x1c7   : > { %1382 = vst [vmem:[%s352_s16] sm:$0xff] %v1380_v47 }
 0x1c8   : > { %1756 = shalt.err (!%p1753_p5)
}
 0x1c9   : > { %s1757_s8 = scalar_lea.hbm %s1399_s19, 256  ;;  %s1761_s15 = scalar_lea.hbm %s2472_s7, 512 }
 0x1ca   : > { %p1758_p6 = scmp.ne.s32.totalorder %s1399_s19, %s1757_s8  ;;  %p1762_p10 = scmp.lt.s32.totalorder %s1399_s19, %s2472_s7 }
 0x1cb   : > { %p1763_p11 = scmp.lt.s32.totalorder %s1761_s15, %s1757_s8 }
 0x1cc   : > { %p1759_p7 = pnand %p1758_p6, %p1918_p4 }
 0x1cd   : > { %p1764_p12 = por %p1763_p11, %p1762_p10 }
 0x1ce   : > { %p1760_p9 = pneg %p1759_p7 }
 0x1d0   : > { %p1765_p13 = pnand %p1764_p12, %p1760_p9 }
 0x1d2   : > { %1768 = shalt.err (!%p1765_p13)
}
 0x1d3   : > { %1600 = dma.vmem_to_hbm [thread:$0]  (%p1918_p4), %s1402_s17, 256, %s1399_s19, %s1385_s22  }
 0x1d4 PF: > { %p1606_p0 = scmp.ge.s32.totalorder %s1819_s29, 2  ;;  %s1413_s20 = sand.u32 1, %s1799_s24  }
 0x1d5   : > { %s1414_s21 = scalar_lea.sflag [#allocation3], %s1413_s20 }
 0x1d6   : > { %p1603_p1 = pnand %p1606_p0, %p1925_p8 }
 0x1d8   : > { %p1604_p2 = pneg %p1603_p1 }
 0x1da   : > { %1794 = dma.done.wait (%p1604_p2), %s1414_s21, 256  }
 0x1db   : > { %1796 = vsyncadd (%p1604_p2), %s1414_s21, 4294967040  ;;  %s20_s29 = sadd.s32 1, %s1819_s29   ;;  %s2475_s24 = smov %s1803_s25 }
 0x1dc   : > { %p17_p3 = scmp.ge.s32.totalorder %s20_s29, 4   ;;  %s2476_s25 = smov %s1807_s26 }
 0x1dd   : > { %s2477_s26 = smov %s1931_s14  ;;  %s2478_s27 = smov %s1815_s28 }
 0x1de   : > { %s2479_s28 = smov %s2481_s9  ;;  %19 = sbr.rel (!%p17_p3) target bundleno = 4 (0x4), region = 107 }
 0x1e3   :  { %1419 = vsyncpa [#allocation3], 1 }
 0x1e4   :  { %1421 = vsyncpa [#allocation3 + $0x1], 1 }

</bundles_post_ra>
